<compile_context>
chip_gen: v6e
topology: v6e:2x2x1
jax: 0.10.0
libtpu: 0.0.40
codegen_flags: <defaults>
</compile_context>

<pallas_src>
import jax
import jax.numpy as jnp
from jax.experimental import pallas as pl
from jax.experimental.pallas import tpu as pltpu


def _round_up(a, m):
    return ((a + m - 1) // m) * m


def _pick_tk(k_pad, target):
    """Largest multiple of 128 that is <= target and divides k_pad."""
    n_blocks = k_pad // 128
    cand = max(1, min(target, k_pad) // 128)
    while cand > 1 and n_blocks % cand != 0:
        cand -= 1
    return cand * 128


def icarl_forward_kernel(x_ref, wb_ref, bb_ref, wc_ref, bc_ref, out_ref, acc_ref):
    """Fused backbone-Linear + ReLU + classifier-Linear, K-reduction accumulator.

    Grid = (B_pad // tm, K_pad // tk); axis 0 parallel (batch), axis 1 arbitrary (K).

    x_ref:   (tm, tk)       bf16 flattened-input tile
    wb_ref:  (tk, F_pad)    bf16 backbone weight K-slab
    bb_ref:  (1,  F_pad)    f32 backbone bias
    wc_ref:  (F_pad, 128)   bf16 classifier weight column block (zero-padded)
    bc_ref:  (1,  128)      f32 classifier bias column block (zero-padded)
    out_ref: (tm, 128)      f32 logits tile (one 128-lane class block)
    acc_ref: (tm, F_pad)    f32 feature accumulator scratch
    """
    k = pl.program_id(1)

    # Partial backbone matmul: bf16 operands, f32 accumulation on the MXU.
    partial = jnp.dot(x_ref[...], wb_ref[...], preferred_element_type=jnp.float32)

    @pl.when(k == 0)
    def _():
        acc_ref[...] = partial          # skip the explicit zero-fill

    @pl.when(k > 0)
    def _():
        acc_ref[...] += partial

    @pl.when(k == pl.num_programs(1) - 1)
    def _():
        # Epilogue in f32 on the VPU (bias + ReLU); downcast only for the MXU.
        feats = jnp.maximum(acc_ref[...] + bb_ref[...], 0.0)
        logits = jnp.dot(feats.astype(jnp.bfloat16), wc_ref[...],
                         preferred_element_type=jnp.float32)
        out_ref[...] = logits + bc_ref[...]


def prepare_icarl_params(params):
    """One-time padding + bf16 cast of the weights (hoisted out of forward)."""
    d_in, feat_dim = params["wb"].shape
    num_class = params["wc"].shape[1]
    k_pad = _round_up(d_in, 128)
    f_pad = _round_up(feat_dim, 128)
    c_pad = _round_up(num_class, 128)

    wb = jnp.zeros((k_pad, f_pad), jnp.bfloat16).at[:d_in, :feat_dim].set(
        params["wb"].astype(jnp.bfloat16))
    bb = jnp.zeros((1, f_pad), jnp.float32).at[:, :feat_dim].set(
        params["bb"].astype(jnp.float32))
    wc = jnp.zeros((f_pad, c_pad), jnp.bfloat16).at[:feat_dim, :num_class].set(
        params["wc"].astype(jnp.bfloat16))
    bc = jnp.zeros((1, c_pad), jnp.float32).at[:, :num_class].set(
        params["bc"].astype(jnp.float32))

    return {"wb": wb, "bb": bb, "wc": wc, "bc": bc,
            "d_in": d_in, "feat_dim": feat_dim, "num_class": num_class,
            "k_pad": k_pad, "f_pad": f_pad, "c_pad": c_pad}


def icarl_forward(x_nchw, prepared, accu_cls_num, *, tm_max=128, tk_target=2048):
    """Pallas-backed equivalent of ICarl.forward (returns logits[:, accu_cls_num])."""
    B = x_nchw.shape[0]
    x_flat = x_nchw.reshape(B, -1).astype(jnp.bfloat16)   # glue: NCHW -> (B, C*H*W)
    d_in = prepared["d_in"]
    k_pad, f_pad, c_pad = prepared["k_pad"], prepared["f_pad"], prepared["c_pad"]
    assert x_flat.shape[1] == d_in

    # Right-size the batch tile (bf16 sublane packing is 16).
    tm = tm_max if B >= tm_max else max(16, _round_up(B, 16))
    b_pad = _round_up(B, tm)
    tk = _pick_tk(k_pad, tk_target)

    # Single-column semantics: only the 128-lane class block containing
    # accu_cls_num is needed (accu_cls_num is a static Python int).
    blk = (accu_cls_num // 128) * 128
    col = accu_cls_num % 128
    c_out = 128
    wc_blk = prepared["wc"][:, blk:blk + c_out]
    bc_blk = prepared["bc"][:, blk:blk + c_out]

    # Per-call x padding only (weights were prepared once).
    xb = jnp.zeros((b_pad, k_pad), jnp.bfloat16).at[:B, :d_in].set(x_flat)

    grid = (b_pad // tm, k_pad // tk)
    n_btiles = grid[0]

    cost = pl.CostEstimate(
        flops=2 * b_pad * k_pad * f_pad + 2 * b_pad * f_pad * c_out,
        transcendentals=0,
        bytes_accessed=(xb.size * 2
                        + n_btiles * (prepared["wb"].size * 2 + wc_blk.size * 2
                                      + prepared["bb"].size * 4 + bc_blk.size * 4)
                        + b_pad * c_out * 4),
    )

    # Double-buffered per-step VMEM footprint, with headroom; cap at v7x's 64 MiB.
    vmem_need = (2 * tm * tk * 2 + 2 * tk * f_pad * 2 + 2 * f_pad * 4
                 + 2 * f_pad * c_out * 2 + 2 * c_out * 4
                 + 2 * tm * c_out * 4 + tm * f_pad * 4)
    vmem_limit = int(min(max(2 * vmem_need, 16 * 1024 * 1024), 64 * 1024 * 1024))

    logits_pad = pl.pallas_call(
        icarl_forward_kernel,
        out_shape=jax.ShapeDtypeStruct((b_pad, c_out), jnp.float32),
        grid_spec=pltpu.PrefetchScalarGridSpec(
            num_scalar_prefetch=0,
            grid=grid,
            in_specs=[
                pl.BlockSpec((tm, tk), lambda i, k: (i, k)),        # x tile
                pl.BlockSpec((tk, f_pad), lambda i, k: (k, 0)),     # wb K-slab
                pl.BlockSpec((1, f_pad), lambda i, k: (0, 0)),      # bb
                pl.BlockSpec((f_pad, c_out), lambda i, k: (0, 0)),  # wc column block
                pl.BlockSpec((1, c_out), lambda i, k: (0, 0)),      # bc column block
            ],
            out_specs=pl.BlockSpec((tm, c_out), lambda i, k: (i, 0)),
            scratch_shapes=[pltpu.VMEM((tm, f_pad), jnp.float32)],
        ),
        compiler_params=pltpu.CompilerParams(
            dimension_semantics=("parallel", "arbitrary"),
            vmem_limit_bytes=vmem_limit,
        ),
        cost_estimate=cost,
    )(xb, prepared["wb"], prepared["bb"], wc_blk, bc_blk)

    # PyTorch: self.network(x)[:, self.accu_cls_num]  (single-column index -> (B,))
    return logits_pad[:B, col]


def init_params(key, d_in, feat_dim, num_class):
    """Deterministic parameter init (uniform, ~nn.Linear default scale)."""
    k1, k2, k3, k4 = jax.random.split(key, 4)
    lim_b = 1.0 / jnp.sqrt(d_in)
    lim_c = 1.0 / jnp.sqrt(feat_dim)
    return {
        "wb": jax.random.uniform(k1, (d_in, feat_dim), jnp.float32, -lim_b, lim_b),
        "bb": jax.random.uniform(k2, (1, feat_dim), jnp.float32, -lim_b, lim_b),
        "wc": jax.random.uniform(k3, (feat_dim, num_class), jnp.float32, -lim_c, lim_c),
        "bc": jax.random.uniform(k4, (1, num_class), jnp.float32, -lim_c, lim_c),
    }


if __name__ == "__main__":
    # Small shapes consistent with the module's forward.
    B, C, H, W = 2, 4, 16, 16
    feat_dim = 32
    init_cls_num, inc_cls_num, task_num = 4, 2, 4
    num_class = init_cls_num + (task_num - 1) * inc_cls_num  # 10
    accu_cls_num = init_cls_num  # cur_task_id == 0 -> accu_cls_num = init_cls_num

    key = jax.random.PRNGKey(0)
    kx, kp = jax.random.split(key)
    x = jax.random.normal(kx, (B, C, H, W), jnp.float32)
    params = init_params(kp, C * H * W, feat_dim, num_class)

    prepared = prepare_icarl_params(params)          # one-time prep (hoisted)
    out = icarl_forward(x, prepared, accu_cls_num)
    out = jax.block_until_ready(out)

    # Reference in plain JAX with the same bf16-operand / f32-accumulate recipe.
    # (bf16 casting changes numerics vs the f32 PyTorch model; 1e-2 tol is expected.)
    x_flat = x.reshape(B, -1)
    feats_ref = jnp.maximum(
        jnp.dot(x_flat.astype(jnp.bfloat16), params["wb"].astype(jnp.bfloat16),
                preferred_element_type=jnp.float32) + params["bb"], 0.0)
    logits_ref = jnp.dot(feats_ref.astype(jnp.bfloat16),
                         params["wc"].astype(jnp.bfloat16),
                         preferred_element_type=jnp.float32) + params["bc"]
    ref = logits_ref[:, accu_cls_num]

    assert out.shape == (B,), out.shape
    assert jnp.allclose(out, ref, atol=1e-2, rtol=1e-2), (out, ref)

    print("KERNEL_OK")
</pallas_src>

<mosaic_0001>
module attributes {stable_mosaic.version = 11 : i64} {
  func.func @icarl_forward_kernel(%arg0: i32, %arg1: i32, %arg2: memref<16x1024xbf16, #tpu.memory_space<vmem>>, %arg3: memref<1024x128xbf16, #tpu.memory_space<vmem>>, %arg4: memref<1x128xf32, #tpu.memory_space<vmem>>, %arg5: memref<128x128xbf16, #tpu.memory_space<vmem>>, %arg6: memref<1x128xf32, #tpu.memory_space<vmem>>, %arg7: memref<16x128xf32, #tpu.memory_space<vmem>>, %arg8: memref<16x128xf32, #tpu.memory_space<vmem>>) attributes {dimension_semantics = [#tpu.dimension_semantics<parallel>, #tpu.dimension_semantics<arbitrary>], iteration_bounds = array<i64: 1, 1>, scalar_prefetch = 0 : i64, scratch_operands = 1 : i64, tpu.core_type = #tpu.core_type<tc>, window_params = [{transform_indices = @transform_0, window_bounds = array<i64: 16, 1024>}, {transform_indices = @transform_1, window_bounds = array<i64: 1024, 128>}, {pipeline_mode = #tpu.pipeline_mode<synchronous>, transform_indices = @transform_2, window_bounds = array<i64: 1, 128>}, {pipeline_mode = #tpu.pipeline_mode<synchronous>, transform_indices = @transform_3, window_bounds = array<i64: 128, 128>}, {pipeline_mode = #tpu.pipeline_mode<synchronous>, transform_indices = @transform_4, window_bounds = array<i64: 1, 128>}, {transform_indices = @transform_5, window_bounds = array<i64: 16, 128>}]} {
    %c0 = arith.constant 0 : index
    %c0_0 = arith.constant 0 : index
    %0 = vector.load %arg2[%c0, %c0_0] : memref<16x1024xbf16, #tpu.memory_space<vmem>>, vector<16x1024xbf16>
    %c0_1 = arith.constant 0 : index
    %c0_2 = arith.constant 0 : index
    %1 = vector.load %arg3[%c0_1, %c0_2] : memref<1024x128xbf16, #tpu.memory_space<vmem>>, vector<1024x128xbf16>
    %cst = arith.constant dense<0.000000e+00> : vector<16x128xf32>
    %2 = tpu.matmul %0, %1, %cst {dimension_numbers = #tpu.dot_dimension_numbers<[1], [0], [0], [1], [0, 0, 1, 1], [], []>} : vector<16x1024xbf16>, vector<1024x128xbf16>, vector<16x128xf32> -> vector<16x128xf32>
    %c0_i32 = arith.constant 0 : i32
    %3 = arith.cmpi eq, %arg1, %c0_i32 : i32
    %4 = arith.extui %3 : i1 to i32
    %c0_i32_3 = arith.constant 0 : i32
    %5 = arith.cmpi ne, %4, %c0_i32_3 : i32
    scf.if %5 {
      %c0_8 = arith.constant 0 : index
      %c0_9 = arith.constant 0 : index
      %12 = vector.load %arg8[%c0_8, %c0_9] : memref<16x128xf32, #tpu.memory_space<vmem>>, vector<16x128xf32>
      tpu.vector_store %arg8[%c0_8, %c0_9], %2 {strides = array<i32>} : memref<16x128xf32, #tpu.memory_space<vmem>>, vector<16x128xf32>,
    } else {
    }
    %c0_i32_4 = arith.constant 0 : i32
    %6 = arith.cmpi sgt, %arg1, %c0_i32_4 : i32
    %7 = arith.extui %6 : i1 to i32
    %c0_i32_5 = arith.constant 0 : i32
    %8 = arith.cmpi ne, %7, %c0_i32_5 : i32
    scf.if %8 {
      %c0_8 = arith.constant 0 : index
      %c0_9 = arith.constant 0 : index
      %12 = vector.load %arg8[%c0_8, %c0_9] : memref<16x128xf32, #tpu.memory_space<vmem>>, vector<16x128xf32>
      %13 = arith.addf %12, %2 : vector<16x128xf32>
      %c0_10 = arith.constant 0 : index
      %c0_11 = arith.constant 0 : index
      %14 = vector.load %arg8[%c0_10, %c0_11] : memref<16x128xf32, #tpu.memory_space<vmem>>, vector<16x128xf32>
      tpu.vector_store %arg8[%c0_10, %c0_11], %13 {strides = array<i32>} : memref<16x128xf32, #tpu.memory_space<vmem>>, vector<16x128xf32>,
    } else {
    }
    %c0_i32_6 = arith.constant 0 : i32
    %9 = arith.cmpi eq, %arg1, %c0_i32_6 : i32
    %10 = arith.extui %9 : i1 to i32
    %c0_i32_7 = arith.constant 0 : i32
    %11 = arith.cmpi ne, %10, %c0_i32_7 : i32
    scf.if %11 {
      %c0_8 = arith.constant 0 : index
      %c0_9 = arith.constant 0 : index
      %12 = vector.load %arg8[%c0_8, %c0_9] : memref<16x128xf32, #tpu.memory_space<vmem>>, vector<16x128xf32>
      %c0_10 = arith.constant 0 : index
      %c0_11 = arith.constant 0 : index
      %13 = vector.load %arg4[%c0_10, %c0_11] : memref<1x128xf32, #tpu.memory_space<vmem>>, vector<1x128xf32>
      %14 = vector.broadcast %13 : vector<1x128xf32> to vector<16x128xf32>
      %15 = arith.addf %12, %14 : vector<16x128xf32>
      %cst_12 = arith.constant 0.000000e+00 : f32
      %16 = vector.broadcast %cst_12 : f32 to vector<16x128xf32>
      %17 = arith.maximumf %15, %16 : vector<16x128xf32>
      %18 = arith.truncf %17 : vector<16x128xf32> to vector<16x128xbf16>
      %c0_13 = arith.constant 0 : index
      %c0_14 = arith.constant 0 : index
      %19 = vector.load %arg5[%c0_13, %c0_14] : memref<128x128xbf16, #tpu.memory_space<vmem>>, vector<128x128xbf16>
      %cst_15 = arith.constant dense<0.000000e+00> : vector<16x128xf32>
      %20 = tpu.matmul %18, %19, %cst_15 {dimension_numbers = #tpu.dot_dimension_numbers<[1], [0], [0], [1], [0, 0, 1, 1], [], []>} : vector<16x128xbf16>, vector<128x128xbf16>, vector<16x128xf32> -> vector<16x128xf32>
      %c0_16 = arith.constant 0 : index
      %c0_17 = arith.constant 0 : index
      %21 = vector.load %arg6[%c0_16, %c0_17] : memref<1x128xf32, #tpu.memory_space<vmem>>, vector<1x128xf32>
      %22 = vector.broadcast %21 : vector<1x128xf32> to vector<16x128xf32>
      %23 = arith.addf %20, %22 : vector<16x128xf32>
      %c0_18 = arith.constant 0 : index
      %c0_19 = arith.constant 0 : index
      %24 = vector.load %arg7[%c0_18, %c0_19] : memref<16x128xf32, #tpu.memory_space<vmem>>, vector<16x128xf32>
      tpu.vector_store %arg7[%c0_18, %c0_19], %23 {strides = array<i32>} : memref<16x128xf32, #tpu.memory_space<vmem>>, vector<16x128xf32>,
    } else {
    }
    return
  }
  func.func @transform_0(%arg0: i32, %arg1: i32) -> (i32, i32) {
    %c0_i32 = arith.constant 0 : i32
    return %arg0, %arg1 : i32, i32
  }
  func.func @transform_1(%arg0: i32, %arg1: i32) -> (i32, i32) {
    %c0_i32 = arith.constant 0 : i32
    %c0_i32_0 = arith.constant 0 : i32
    return %arg1, %c0_i32 : i32, i32
  }
  func.func @transform_2(%arg0: i32, %arg1: i32) -> (i32, i32) {
    %c0_i32 = arith.constant 0 : i32
    %c0_i32_0 = arith.constant 0 : i32
    %c0_i32_1 = arith.constant 0 : i32
    return %c0_i32, %c0_i32_0 : i32, i32
  }
  func.func @transform_3(%arg0: i32, %arg1: i32) -> (i32, i32) {
    %c0_i32 = arith.constant 0 : i32
    %c0_i32_0 = arith.constant 0 : i32
    %c0_i32_1 = arith.constant 0 : i32
    return %c0_i32, %c0_i32_0 : i32, i32
  }
  func.func @transform_4(%arg0: i32, %arg1: i32) -> (i32, i32) {
    %c0_i32 = arith.constant 0 : i32
    %c0_i32_0 = arith.constant 0 : i32
    %c0_i32_1 = arith.constant 0 : i32
    return %c0_i32, %c0_i32_0 : i32, i32
  }
  func.func @transform_5(%arg0: i32, %arg1: i32) -> (i32, i32) {
    %c0_i32 = arith.constant 0 : i32
    %c0_i32_0 = arith.constant 0 : i32
    return %arg0, %c0_i32 : i32, i32
  }
}

</mosaic_0001>

<bundles_post_ra>
// kernel: tpu_custom_call.1
= control target key start
LH: loop header
LB: loop body
LE: loop exit
PB: predicated region body
PF: predicated region fallthrough
CT: control target
= control target key end

     0   :  { %10 = vsyncpa [#allocation4], 0  ;;  %s1381_s0 = inlined_call_operand.hbm [shape: bf16[16,1024], index: 0, kind: input, shape index: {}]   ;;  %s1382_s1 = inlined_call_operand.hbm [shape: bf16[1024,128], index: 1, kind: input, shape index: {}]   ;;  %s1383_s2 = inlined_call_operand.vmem [shape: f32[1,128], index: 2, kind: input, shape index: {}]   ;;  %s1384_s3 = inlined_call_operand.hbm [shape: bf16[128,128], index: 3, kind: input, shape index: {}]   ;;  %s1385_s4 = inlined_call_operand.vmem [shape: f32[1,128], index: 4, kind: input, shape index: {}]   ;;  %s1386_s5 = inlined_call_operand.hbm [shape: f32[16,128], index: 5, kind: output, shape index: {}]  }
   0x1   :  { %11 = vsyncpa [#allocation7], 0 }
   0x2   :  { %12 = vsyncpa [#allocation5], 0  ;;  %s1321_s18 = smov [#allocation6]  }
   0x3   :  { %s30_s19 = sshll.u32 %s1321_s18, 4  ;;  %s31_s19 = int_to_ptr.vmem [resolvable:$true] %s30_s19 }
   0x4   :  { %s1243_s20 = scalar_lea.vmem %s31_s19, 8192  ;;  %p1248_p1 = scmp.lt.s32.totalorder %s31_s19, %s31_s19 }
   0x5   :  { %p1244_p0 = scmp.ne.s32.totalorder %s31_s19, %s1243_s20  ;;  %p1249_p2 = scmp.lt.s32.totalorder %s1243_s20, %s1243_s20 }
   0x7   :  { %p1250_p3 = por %p1249_p2, %p1248_p1 }
   0x9   :  { %p1251_p4 = pnand %p1250_p3, %p1244_p0 }
   0xb   :  { %1254 = shalt.err (!%p1251_p4)
}
   0xc   :  { %s1322_s21 = smov 64   ;;  %s1323_s22 = smov 4  }
   0xd   :  { %36 = dma.hbm_to_vmem [thread:$0]  %s1382_s1, 8192, %s31_s19, [#allocation7], %s1322_s21, %s1322_s21, %s1323_s22  }
   0xe   :  { %s1324_s25 = smov [#allocation3]  }
   0xf   :  { %s18_s26 = sshll.u32 %s1324_s25, 4  ;;  %s19_s26 = int_to_ptr.vmem [resolvable:$true] %s18_s26 }
  0x10   :  { %s1263_s27 = scalar_lea.vmem %s19_s26, 1024  ;;  %p1268_p6 = scmp.lt.s32.totalorder %s19_s26, %s19_s26 }
  0x11   :  { %p1264_p5 = scmp.ne.s32.totalorder %s19_s26, %s1263_s27  ;;  %p1269_p7 = scmp.lt.s32.totalorder %s1263_s27, %s1263_s27 }
  0x13   :  { %p1270_p8 = por %p1269_p7, %p1268_p6 }
  0x15   :  { %p1271_p9 = pnand %p1270_p8, %p1264_p5 }
  0x17   :  { %1274 = shalt.err (!%p1271_p9)
}
  0x18   :  { %s1325_s28 = smov 512   ;;  %s1326_s29 = smov 32  }
  0x19   :  { %24 = dma.hbm_to_vmem [thread:$0]  %s1381_s0, 1024, %s19_s26, [#allocation4], %s1325_s28, %s1325_s28, %s1326_s29  }
  0x1a   :  { %s1327_s7 = smov [#allocation8]  }
  0x1b   :  { %s44_s8 = sshll.u32 %s1327_s7, 4  ;;  %s45_s8 = int_to_ptr.vmem [resolvable:$true] %s44_s8 }
  0x1c   :  { %s1283_s1 = scalar_lea.vmem %s45_s8, 1024  ;;  %p1288_p11 = scmp.lt.s32.totalorder %s45_s8, %s45_s8 }
  0x1d   :  { %p1284_p10 = scmp.ne.s32.totalorder %s45_s8, %s1283_s1  ;;  %p1289_p12 = scmp.lt.s32.totalorder %s1283_s1, %s1283_s1 }
  0x1f   :  { %p1290_p13 = por %p1289_p12, %p1288_p11 }
  0x21   :  { %p1291_p0 = pnand %p1290_p13, %p1284_p10 }
  0x23   :  { %1294 = shalt.err (!%p1291_p0)
}
  0x24   :  { %50 = dma.hbm_to_vmem [thread:$0]  %s1384_s3, 1024, %s45_s8, [#allocation7], %s1322_s21, %s1322_s21, %s1323_s22  }
  0x25   :  { %1315 = dma.done.wait [#allocation4], 1024  }
  0x26   :  { %1316 = vsyncadd [#allocation4], 4294966272 }
  0x27   :  { %1317 = dma.done.wait [#allocation7], 9216  }
  0x28   :  { %1318 = vsyncadd [#allocation7], 4294958080  ;;  %v1163_v0 = vld [vmem:[#allocation6 + $0x78] sm:$0xff]   ;;  %v1167_v4 = vld [vmem:[#allocation6 + $0x70] sm:$0xff]   ;;  %vm1329_vm0 = vmmov 0   ;;  %s1330_s13 = smov [#allocation9]  }
  0x29   :  { %v1164_v1 = vld [vmem:[#allocation6 + $0xf8] sm:$0xff]   ;;  %1034 = vmatprep.subr.bf16.mxu0 %v1163_v0  ;;  %v1168_v5 = vld [vmem:[#allocation6 + $0xf0] sm:$0xff]   ;;  %v1171_v8 = vld [vmem:[#allocation6 + $0x68] sm:$0xff]   ;;  %s939_s14 = sshll.u32 %s1330_s13, 4  ;;  %s940_s14 = int_to_ptr.vmem [resolvable:$true] %s939_s14 }
  0x2a   :  { %v1165_v2 = vld [vmem:[#allocation6 + $0x38] sm:$0xff]   ;;  %1056 = vmatprep.subr.bf16.mxu1 %v1164_v1  ;;  %v1169_v6 = vld [vmem:[#allocation6 + $0x30] sm:$0xff]   ;;  %v1172_v9 = vld [vmem:[#allocation6 + $0xe8] sm:$0xff]   ;;  %p1300_p2 = scmp.lt.s32.totalorder %s940_s14, %s940_s14 }
  0x2b   :  { %v1166_v3 = vld [vmem:[#allocation6 + $0xb8] sm:$0xff]   ;;  %1035 = vmatpush3.bf16.msra.mxu0 %v1165_v2  ;;  %v1170_v7 = vld [vmem:[#allocation6 + $0xb0] sm:$0xff]   ;;  %v1173_v10 = vld [vmem:[#allocation6 + $0x28] sm:$0xff]  }
  0x2c   :  { %1057 = vmatpush3.bf16.msra.mxu1 %v1166_v3  ;;  %1036 = vmatprep.subr.bf16.mxu0 %v1167_v4  ;;  %v1174_v11 = vld [vmem:[#allocation6 + $0xa8] sm:$0xff]   ;;  %v1175_v12 = vld [vmem:[#allocation6 + $0x60] sm:$0xff]   ;;  %v1179_v16 = vld [vmem:[#allocation6 + $0x58] sm:$0xff]  }
  0x2d   :  { %1058 = vmatprep.subr.bf16.mxu1 %v1168_v5  ;;  %v1176_v13 = vld [vmem:[#allocation6 + $0xe0] sm:$0xff]   ;;  %v1180_v17 = vld [vmem:[#allocation6 + $0xd8] sm:$0xff]   ;;  %v1183_v20 = vld [vmem:[#allocation6 + $0x50] sm:$0xff]  }
  0x2e   :  { %v1177_v14 = vld [vmem:[#allocation6 + $0x20] sm:$0xff]   ;;  %v1181_v18 = vld [vmem:[#allocation6 + $0x18] sm:$0xff]   ;;  %v1184_v21 = vld [vmem:[#allocation6 + $0xd0] sm:$0xff]  }
  0x2f   :  { %1037 = vmatpush3.bf16.msra.mxu0 %v1169_v6  ;;  %v1178_v15 = vld [vmem:[#allocation6 + $0xa0] sm:$0xff]   ;;  %v1182_v19 = vld [vmem:[#allocation6 + $0x98] sm:$0xff]   ;;  %v1185_v22 = vld [vmem:[#allocation6 + $0x10] sm:$0xff]  }
  0x30   :  { %1059 = vmatpush3.bf16.msra.mxu1 %v1170_v7  ;;  %1038 = vmatprep.subr.bf16.mxu0 %v1171_v8  ;;  %v1186_v23 = vld [vmem:[#allocation6 + $0x90] sm:$0xff]   ;;  %v1187_v24 = vld [vmem:[#allocation6 + $0x48] sm:$0xff]   ;;  %v1191_v28 = vld [vmem:[#allocation6 + $0x40] sm:$0xff]  }
  0x31   :  { %1060 = vmatprep.subr.bf16.mxu1 %v1172_v9  ;;  %v1188_v25 = vld [vmem:[#allocation6 + $0xc8] sm:$0xff]   ;;  %v1192_v29 = vld [vmem:[#allocation6 + $0xc0] sm:$0xff]   ;;  %v1195_v40 = vld [vmem:[#allocation6 + $0x178] sm:$0xff]  }
  0x32   :  { %v1189_v26 = vld [vmem:[#allocation6 + $0x8] sm:$0xff]   ;;  %v1193_v30 = vld [vmem:[#allocation6] sm:$0xff]   ;;  %v1196_v41 = vld [vmem:[#allocation6 + $0x1f8] sm:$0xff]  }
  0x33   :  { %1039 = vmatpush3.bf16.msra.mxu0 %v1173_v10  ;;  %v1190_v27 = vld [vmem:[#allocation6 + $0x88] sm:$0xff]   ;;  %v1194_v31 = vld [vmem:[#allocation6 + $0x80] sm:$0xff]   ;;  %v1197_v42 = vld [vmem:[#allocation6 + $0x138] sm:$0xff]  }
  0x34   :  { %1061 = vmatpush3.bf16.msra.mxu1 %v1174_v11  ;;  %1040 = vmatprep.subr.bf16.mxu0 %v1175_v12  ;;  %v63_v32 = vld [vmem:[#allocation3] sm:$0xff]  ;;  %v64_v34 = vld [vmem:[#allocation3 + $0x8] sm:$0xff]  ;;  %v1198_v43 = vld [vmem:[#allocation6 + $0x1b8] sm:$0xff]  }
  0x35   :  { %1062 = vmatprep.subr.bf16.mxu1 %v1176_v13  ;;  %v67_v33 = vld [vmem:[#allocation3 + $0x20] sm:$0xff]  ;;  %v68_v37 = vld [vmem:[#allocation3 + $0x28] sm:$0xff]  ;;  %v1199_v44 = vld [vmem:[#allocation6 + $0x170] sm:$0xff]  }
  0x36   :  { %v952_v35 = vcombine.low %v63_v32, %v67_v33  ;;  %v953_v36 = vcombine.high %v63_v32, %v67_v33  ;;  %v954_v38 = vcombine.low %v64_v34, %v68_v37  ;;  %v955_v39 = vcombine.high %v64_v34, %v68_v37  ;;  %v1200_v45 = vld [vmem:[#allocation6 + $0x1f0] sm:$0xff]   ;;  %v1203_v48 = vld [vmem:[#allocation6 + $0x168] sm:$0xff]   ;;  %v1207_v52 = vld [vmem:[#allocation6 + $0x160] sm:$0xff]  }
  0x37   :  { %1041 = vmatpush3.bf16.msra.mxu0 %v1177_v14  ;;  %v1201_v46 = vld [vmem:[#allocation6 + $0x130] sm:$0xff]   ;;  %v1204_v49 = vld [vmem:[#allocation6 + $0x1e8] sm:$0xff]   ;;  %v1208_v53 = vld [vmem:[#allocation6 + $0x1e0] sm:$0xff]  }
  0x38   :  { %1063 = vmatpush3.bf16.msra.mxu1 %v1178_v15  ;;  %1042 = vmatprep.subr.bf16.mxu0 %v1179_v16  ;;  %v1202_v47 = vld [vmem:[#allocation6 + $0x1b0] sm:$0xff]   ;;  %v1205_v50 = vld [vmem:[#allocation6 + $0x128] sm:$0xff]   ;;  %v1209_v54 = vld [vmem:[#allocation6 + $0x120] sm:$0xff]  }
  0x39   :  { %1064 = vmatprep.subr.bf16.mxu1 %v1180_v17  ;;  %655 = vmatprep.mubr.bf16.mxu0 %v953_v36  ;;  %v1206_v51 = vld [vmem:[#allocation6 + $0x1a8] sm:$0xff]   ;;  %v1210_v55 = vld [vmem:[#allocation6 + $0x1a0] sm:$0xff]   ;;  %v1211_v56 = vld [vmem:[#allocation6 + $0x158] sm:$0xff]   ;;  %v1328_v17 = vmov 0.0  }
  0x3a   :  { %696 = vmatprep.mubr.bf16.mxu1 %v955_v39  ;;  %v1212_v57 = vld [vmem:[#allocation6 + $0x1d8] sm:$0xff]   ;;  %v1215_v60 = vld [vmem:[#allocation6 + $0x150] sm:$0xff]   ;;  %v1219_v0 = vld [vmem:[#allocation6 + $0x148] sm:$0xff]  }
  0x3b   :  { %1043 = vmatpush3.bf16.msra.mxu0 %v1181_v18  ;;  %v1213_v58 = vld [vmem:[#allocation6 + $0x118] sm:$0xff]   ;;  %v1216_v61 = vld [vmem:[#allocation6 + $0x1d0] sm:$0xff]   ;;  %v1220_v1 = vld [vmem:[#allocation6 + $0x1c8] sm:$0xff]  }
  0x3c   :  { %1065 = vmatpush3.bf16.msra.mxu1 %v1182_v19  ;;  %1044 = vmatprep.subr.bf16.mxu0 %v1183_v20  ;;  %v1214_v59 = vld [vmem:[#allocation6 + $0x198] sm:$0xff]   ;;  %v1217_v62 = vld [vmem:[#allocation6 + $0x110] sm:$0xff]   ;;  %v1221_v2 = vld [vmem:[#allocation6 + $0x108] sm:$0xff]  }
  0x3d   :  { %1066 = vmatprep.subr.bf16.mxu1 %v1184_v21  ;;  %v1218_v63 = vld [vmem:[#allocation6 + $0x190] sm:$0xff]   ;;  %v1222_v3 = vld [vmem:[#allocation6 + $0x188] sm:$0xff]   ;;  %v1223_v4 = vld [vmem:[#allocation6 + $0x140] sm:$0xff]  }
  0x3e   :  { %v1224_v5 = vld [vmem:[#allocation6 + $0x1c0] sm:$0xff]   ;;  %v65_v8 = vld [vmem:[#allocation3 + $0x10] sm:$0xff]  ;;  %v66_v12 = vld [vmem:[#allocation3 + $0x18] sm:$0xff] }
  0x3f   :  { %1045 = vmatpush3.bf16.msra.mxu0 %v1185_v22  ;;  %v1225_v6 = vld [vmem:[#allocation6 + $0x100] sm:$0xff]   ;;  %v69_v9 = vld [vmem:[#allocation3 + $0x30] sm:$0xff]  ;;  %v70_v13 = vld [vmem:[#allocation3 + $0x38] sm:$0xff] }
  0x40   :  { %1067 = vmatpush3.bf16.msra.mxu1 %v1186_v23  ;;  %1046 = vmatprep.subr.bf16.mxu0 %v1187_v24  ;;  %v1226_v7 = vld [vmem:[#allocation6 + $0x180] sm:$0xff]   ;;  %v956_v10 = vcombine.low %v65_v8, %v69_v9  ;;  %v957_v11 = vcombine.high %v65_v8, %v69_v9  ;;  %v958_v14 = vcombine.low %v66_v12, %v70_v13  ;;  %v1227_v16 = vld [vmem:[#allocation8 + $0x38] sm:$0xff]   ;;  %v1228_v18 = vld [vmem:[#allocation8 + $0x30] sm:$0xff]  }
  0x41   :  { %1068 = vmatprep.subr.bf16.mxu1 %v1188_v25  ;;  %v959_v15 = vcombine.high %v66_v12, %v70_v13  ;;  %v1229_v19 = vld [vmem:[#allocation8 + $0x28] sm:$0xff]   ;;  %v1230_v20 = vld [vmem:[#allocation8 + $0x20] sm:$0xff]   ;;  %v1231_v21 = vld [vmem:[#allocation8 + $0x18] sm:$0xff]  }
  0x42   :  { %v1232_v22 = vld [vmem:[#allocation8 + $0x10] sm:$0xff]   ;;  %v1233_v23 = vld [vmem:[#allocation8 + $0x8] sm:$0xff]   ;;  %v1234_v24 = vld [vmem:[#allocation8] sm:$0xff]  }
  0x43   :  { %1047 = vmatpush3.bf16.msra.mxu0 %v1189_v26 }
  0x44   :  { %1069 = vmatpush3.bf16.msra.mxu1 %v1190_v27  ;;  %1048 = vmatprep.subr.bf16.mxu0 %v1191_v28 }
  0x45   :  { %1070 = vmatprep.subr.bf16.mxu1 %v1192_v29 }
  0x47   :  { %1049 = vmatpush3.bf16.msra.mxu0 %v1193_v30 }
  0x48   :  { %1071 = vmatpush3.bf16.msra.mxu1 %v1194_v31  ;;  %1078 = vmatprep.subr.bf16.mxu0 %v1195_v40 }
  0x49   :  { %1100 = vmatprep.subr.bf16.mxu1 %v1196_v41 }
  0x4a   :  { %656 = vmatmul.mubr.bf16.vlgmr.msra.gmra.mxu0 %v952_v35 }
  0x4b   :  { %697 = vmatmul.mubr.bf16.vlgmr.msra.gmra.mxu1 %v954_v38  ;;  %1079 = vmatpush3.bf16.msra.mxu0 %v1197_v42 }
  0x4c   :  { %1101 = vmatpush3.bf16.msra.mxu1 %v1198_v43  ;;  %1080 = vmatprep.subr.bf16.mxu0 %v1199_v44 }
  0x4d   :  { %1102 = vmatprep.subr.bf16.mxu1 %v1200_v45  ;;  %737 = vmatprep.mubr.bf16.mxu0 %v957_v11 }
  0x4e   :  { %778 = vmatprep.mubr.bf16.mxu1 %v959_v15 }
  0x4f   :  { %1081 = vmatpush3.bf16.msra.mxu0 %v1201_v46 }
  0x50   :  { %1103 = vmatpush3.bf16.msra.mxu1 %v1202_v47  ;;  %1082 = vmatprep.subr.bf16.mxu0 %v1203_v48 }
  0x51   :  { %1104 = vmatprep.subr.bf16.mxu1 %v1204_v49 }
  0x53   :  { %1083 = vmatpush3.bf16.msra.mxu0 %v1205_v50 }
  0x54   :  { %1105 = vmatpush3.bf16.msra.mxu1 %v1206_v51  ;;  %1084 = vmatprep.subr.bf16.mxu0 %v1207_v52  ;;  %v1024_v52 = vld [vmem:[%s1383_s2] ss:$0 sm:$0xff]  ;;  %s1295_s2 = scalar_lea.vmem %s940_s14, 256 }
  0x55   :  { %1106 = vmatprep.subr.bf16.mxu1 %v1208_v53  ;;  %p1296_p1 = scmp.ne.s32.totalorder %s940_s14, %s1295_s2  ;;  %p1301_p3 = scmp.lt.s32.totalorder %s1295_s2, %s1295_s2 }
  0x57   :  { %1085 = vmatpush3.bf16.msra.mxu0 %v1209_v54  ;;  %p1302_p4 = por %p1301_p3, %p1300_p2 }
  0x58   :  { %1107 = vmatpush3.bf16.msra.mxu1 %v1210_v55  ;;  %1086 = vmatprep.subr.bf16.mxu0 %v1211_v56 }
  0x59   :  { %1108 = vmatprep.subr.bf16.mxu1 %v1212_v57  ;;  %p1303_p5 = pnand %p1302_p4, %p1296_p1 }
  0x5b   :  { %1087 = vmatpush3.bf16.msra.mxu0 %v1213_v58 }
  0x5c   :  { %1109 = vmatpush3.bf16.msra.mxu1 %v1214_v59  ;;  %1088 = vmatprep.subr.bf16.mxu0 %v1215_v60 }
  0x5d   :  { %1110 = vmatprep.subr.bf16.mxu1 %v1216_v61  ;;  %v1025_v61 = vld [vmem:[%s1385_s4] ss:$0 sm:$0xff] }
  0x5f   :  { %1089 = vmatpush3.bf16.msra.mxu0 %v1217_v62 }
  0x60   :  { %1111 = vmatpush3.bf16.msra.mxu1 %v1218_v63  ;;  %1090 = vmatprep.subr.bf16.mxu0 %v1219_v0 }
  0x61   :  { %1112 = vmatprep.subr.bf16.mxu1 %v1220_v1 }
  0x63   :  { %1091 = vmatpush3.bf16.msra.mxu0 %v1221_v2 }
  0x64   :  { %1113 = vmatpush3.bf16.msra.mxu1 %v1222_v3  ;;  %1092 = vmatprep.subr.bf16.mxu0 %v1223_v4 }
  0x65   :  { %1114 = vmatprep.subr.bf16.mxu1 %v1224_v5 }
  0x67   :  { %1093 = vmatpush3.bf16.msra.mxu0 %v1225_v6 }
  0x68   :  { %1115 = vmatpush3.bf16.msra.mxu1 %v1226_v7  ;;  %1131 = vmatprep.subr.bf16.mxu0 %v1328_v17 }
  0x6a   :  { %738 = vmatmul.mubr.bf16.vlgmr.msra.gmra.mxu0 %v956_v10 }
  0x6b   :  { %779 = vmatmul.mubr.bf16.vlgmr.msra.gmra.mxu1 %v958_v14  ;;  %1132 = vmatpush3.bf16.msra.mxu0 %v1227_v16 }
  0x6c   :  { %1133 = vmatprep.subr.bf16.mxu0 %v1328_v17  ;;  %1147 = vmatprep.mubr.msk.bf16.mxu0 %vm1329_vm0, %v1328_v17 }
  0x6f   :  { %1134 = vmatpush3.bf16.msra.mxu0 %v1228_v18 }
  0x70   :  { %1135 = vmatprep.subr.bf16.mxu0 %v1328_v17 }
  0x73   :  { %1136 = vmatpush3.bf16.msra.mxu0 %v1229_v19 }
  0x74   :  { %1137 = vmatprep.subr.bf16.mxu0 %v1328_v17 }
  0x77   :  { %1138 = vmatpush3.bf16.msra.mxu0 %v1230_v20 }
  0x78   :  { %1139 = vmatprep.subr.bf16.mxu0 %v1328_v17 }
  0x7b   :  { %1140 = vmatpush3.bf16.msra.mxu0 %v1231_v21 }
  0x7c   :  { %1141 = vmatprep.subr.bf16.mxu0 %v1328_v17 }
  0x7f   :  { %1142 = vmatpush3.bf16.msra.mxu0 %v1232_v22 }
  0x80   :  { %1143 = vmatprep.subr.bf16.mxu0 %v1328_v17 }
  0x83   :  { %1144 = vmatpush3.bf16.msra.mxu0 %v1233_v23 }
  0x84   :  { %1145 = vmatprep.subr.bf16.mxu0 %v1328_v17 }
  0x87   :  { %1146 = vmatpush3.bf16.msra.mxu0 %v1234_v24 }
 0x10a   :  { %v1050_v25 = vpop.f32.mrf.mxu0 }
 0x10b   :  { %v1072_v26 = vpop.f32.mrf.mxu1 }
 0x10c   :  { %v1051_v27 = vpop.f32.mrf.mxu0 }
 0x10d   :  { %v1073_v28 = vpop.f32.mrf.mxu1  ;;  %v1052_v32 = vadd.f32 %v1051_v27, %v1050_v25 }
 0x10e   :  { %v1053_v29 = vpop.f32.mrf.mxu0  ;;  %v1074_v33 = vadd.f32 %v1073_v28, %v1072_v26 }
 0x10f   :  { %v1075_v30 = vpop.f32.mrf.mxu1 }
 0x110   :  { %v1054_v31 = vpop.f32.mrf.mxu0  ;;  %v699_v38 = vadd.f32 %v1074_v33, %v1052_v32 }
 0x111   :  { %v1076_v34 = vpop.f32.mrf.mxu1  ;;  %v1055_v39 = vadd.f32 %v1054_v31, %v1053_v29 }
 0x112   :  { %v1077_v40 = vadd.f32 %v1076_v34, %v1075_v30 }
 0x114   :  { %v702_v48 = vadd.f32 %v1077_v40, %v1055_v39 }
 0x12a   :  { %v1094_v35 = vpop.f32.mrf.mxu0 }
 0x12b   :  { %v1116_v36 = vpop.f32.mrf.mxu1 }
 0x12c   :  { %v1095_v37 = vpop.f32.mrf.mxu0 }
 0x12d   :  { %v1096_v41 = vadd.f32 %v1095_v37, %v1094_v35  ;;  %v1117_v42 = vpop.f32.mrf.mxu1 }
 0x12e   :  { %v1097_v43 = vpop.f32.mrf.mxu0  ;;  %v1118_v45 = vadd.f32 %v1117_v42, %v1116_v36 }
 0x12f   :  { %v740_v44 = vadd.f32 %v1096_v41, %v699_v38  ;;  %v1119_v46 = vpop.f32.mrf.mxu1 }
 0x130   :  { %v1098_v47 = vpop.f32.mrf.mxu0 }
 0x131   :  { %v781_v49 = vadd.f32 %v1118_v45, %v740_v44  ;;  %v1099_v50 = vadd.f32 %v1098_v47, %v1097_v43  ;;  %v1120_v51 = vpop.f32.mrf.mxu1 }
 0x132   :  { %v1121_v54 = vadd.f32 %v1120_v51, %v1119_v46 }
 0x133   :  { %v743_v53 = vadd.f32 %v1099_v50, %v702_v48  ;;  %v815_v55 = vadd.f32 %v1024_v52, %v781_v49 }
 0x135   :  { %v784_v56 = vadd.f32 %v1121_v54, %v743_v53  ;;  %v817_v58 = vmax.f32 %v815_v55, 0.0 }
 0x137   :  { %v816_v57 = vadd.f32 %v1024_v52, %v784_v56 }
 0x139   :  { %v818_v59 = vmax.f32 %v816_v57, 0.0 }
 0x13b   :  { %v819_v60 = vpack.c.bf16 %v818_v59, %v817_v58 }
 0x13d   :  { %1148 = vmatmul.mubr.bf16.vlgmr.msra.gmra.mxu0 %v819_v60 }
 0x1fd   :  { %v925_v62 = vpop.f32.mrf.mxu0 }
 0x1fe   :  { %v926_v63 = vadd.f32 %v1025_v61, %v925_v62 }
 0x1ff   :  { %v1149_v0 = vpop.f32.mrf.mxu0 }
 0x200   :  { %932 = vst [vmem:[#allocation9] sm:$0xff] %v926_v63 }
 0x201   :  { %v928_v1 = vpop.f32.mrf.mxu0 }
 0x202   :  { %v929_v2 = vadd.f32 %v1025_v61, %v928_v1 }
 0x203   :  { %v1150_v3 = vpop.f32.mrf.mxu0 }
 0x204   :  { %933 = vst [vmem:[#allocation9 + $0x8] sm:$0xff] %v929_v2 }
 0x205   :  { %1306 = shalt.err (!%p1303_p5)
}
 0x206   :  { %s1331_s15 = smov 128   ;;  %s1332_s4 = smov 8  }
 0x207   :  { %945 = dma.vmem_to_hbm [thread:$0]  %s940_s14, 256, %s1386_s5, [#allocation5], %s1331_s15, %s1331_s15, %s1332_s4  }
 0x208   :  { %1319 = dma.done.wait [#allocation5], 256  }
 0x209   :  { %1320 = vsyncadd [#allocation5], 4294967040 }
 0x20a   :  { %949 = vsyncpa [#allocation4], 1 }
 0x20b   :  { %950 = vsyncpa [#allocation7], 1 }
 0x20c   :  { %951 = vsyncpa [#allocation5], 1 }

</bundles_post_ra>
